<compile_context>
chip_gen: v5e
topology: v5e:2x2
jax: 0.10.0
libtpu: 0.0.40
codegen_flags: <defaults>
</compile_context>

<pallas_src>
import math
import numpy as np
import jax
import jax.numpy as jnp
from jax import lax
from jax.experimental import pallas as pl
from jax.experimental.pallas import tpu as pltpu


# --------------------------------------------------------------------------- #
# Kernel: accumulate g = y @ W_g^T over K tiles; emit per-sample sum(g^2).
# --------------------------------------------------------------------------- #
def _plp_sumsq_kernel(y_ref, wg_ref, out_ref, acc_ref):
    k = pl.program_id(1)

    @pl.when(k == 0)
    def _():
        acc_ref[...] = jnp.zeros_like(acc_ref)

    # y block: [B, tk]; W_g block: [tn, tk]  ->  contract over K (dim 1 of both),
    # an implicit trans_b matmul on the MXU; no transpose is materialized.
    acc_ref[...] += lax.dot_general(
        y_ref[...], wg_ref[...],
        dimension_numbers=(((1,), (1,)), ((), ())),
        preferred_element_type=jnp.float32)

    @pl.when(k == pl.num_programs(1) - 1)
    def _():
        g = acc_ref[...]                                       # [B, tn] f32
        out_ref[0] = jnp.sum(g * g, axis=1, keepdims=True)     # -> [B, 1]


# --------------------------------------------------------------------------- #
# Generation-aware sizing helpers.
# --------------------------------------------------------------------------- #
def _chip_profile():
    """(VMEM capacity bytes, whether >1 TensorCore shares the grid)."""
    vmem_cap = 64 << 20                         # conservative fallback (v7x per-TC)
    try:
        vmem_cap = int(pltpu.get_tpu_info().vmem_capacity_bytes)
    except Exception:
        pass
    multi_tc = False
    try:
        kind = jax.devices()[0].device_kind.lower()
        multi_tc = "v7" in kind                 # v7x: 2 TensorCores per chip
    except Exception:
        pass
    return vmem_cap, multi_tc


def _sizing(vmem_cap, multi_tc):
    """Returns (vmem_limit_bytes, W_g pipeline buffer count, per-buffer byte budget)."""
    if vmem_cap >= (96 << 20):                  # v5e / v6e: 128 MiB physical VMEM
        vmem_limit = min(100 << 20, (vmem_cap * 4) // 5)
        wg_bufs = 2
    else:                                       # v7x: 64 MiB per TensorCore
        vmem_limit = min(52 << 20, (vmem_cap * 4) // 5)
        wg_bufs = 3 if multi_tc else 2          # Buffered(3): keep DMA queue a tile ahead
    budget = max(8 << 20, (vmem_limit * 4) // (5 * wg_bufs))
    return vmem_limit, wg_bufs, budget


def _sublane_pack(dtype):
    # Sublane packing granularity: f32 -> 8, bf16 -> 16, 8-bit -> 32.
    return 8 * max(1, 4 // jnp.dtype(dtype).itemsize)


def _choose_splits(N, dtype, multi_tc):
    # Split the L*D axis across TensorCores only on multi-TC chips (v7x); on
    # single-TC chips a split is just two sequential passes (pure overhead).
    pack = _sublane_pack(dtype)
    if multi_tc and N % 2 == 0 and (N // 2) % pack == 0 and (N // 2) >= 128:
        return 2
    return 1


def _choose_k_tile(K, tn, itemsize, budget_bytes, max_tk):
    """Pick the K tile (multiple of 128) under the per-buffer budget; return (tk, K_pad)."""
    tk_cap = max(128, (budget_bytes // max(1, tn * itemsize)) // 128 * 128)
    if max_tk is not None:
        tk_cap = max(128, (min(tk_cap, int(max_tk)) // 128) * 128)
    K128 = ((K + 127) // 128) * 128             # lane-align K (zero pad -> contributes 0)
    if K128 <= tk_cap:
        return K128, K128                       # single K block
    # Prefer an exact 128-multiple divisor of K128 that keeps tiles large.
    tk = None
    t = tk_cap
    while t >= 128:
        if K128 % t == 0:
            tk = t
            break
        t -= 128
    if tk is None or 2 * tk < tk_cap:
        # Only small divisors exist -> pad K up to a multiple of the capped tk
        # instead of collapsing to narrow tiles.
        tk = tk_cap
    K_pad = ((K128 + tk - 1) // tk) * tk
    return tk, K_pad


def _wg_block_spec(tn, tk, buffer_count):
    index_map = lambda n, k: (n, k)
    if buffer_count > 2:
        try:  # deeper pipelining of the streamed weight (v7x); fall back if unsupported
            return pl.BlockSpec((tn, tk), index_map,
                                pipeline_mode=pl.Buffered(buffer_count))
        except TypeError:
            pass
    return pl.BlockSpec((tn, tk), index_map)


# --------------------------------------------------------------------------- #
# Forward step.
# --------------------------------------------------------------------------- #
def path_length_penalty(w, x, y, W_g, steps, exp_sum_a, *, beta,
                        stream_dtype=None, max_tk=None):
    """One PathLengthPenalty forward step. Returns (loss, new_steps, new_exp_sum_a)."""
    B, C, H, Wd = x.shape
    _, L, D = w.shape
    K = C * H * Wd
    N = L * D
    inv_sqrt_hw = 1.0 / math.sqrt(H * Wd)       # image_size = x.shape[2] * x.shape[3]

    W_g = jnp.asarray(W_g)                      # [L*D, K], kept untransposed
    assert W_g.shape == (N, K)
    if stream_dtype is not None:
        # bf16 streaming halves HBM bytes on the dominant operand (perf review's
        # biggest lever); it is an explicit numerics trade, so it stays opt-in.
        W_g = W_g.astype(stream_dtype)
    y_flat = jnp.reshape(y, (B, K)).astype(W_g.dtype)

    itemsize = jnp.dtype(W_g.dtype).itemsize
    vmem_cap, multi_tc = _chip_profile()
    vmem_limit, wg_bufs, budget = _sizing(vmem_cap, multi_tc)

    n_splits = _choose_splits(N, W_g.dtype, multi_tc)   # 2 only on v7x
    tn = N // n_splits
    tk, K_pad = _choose_k_tile(K, tn, itemsize, budget, max_tk)
    if K_pad != K:
        # Zero-padded K columns contribute 0 to the accumulation -> free correctness.
        y_flat = jnp.pad(y_flat, ((0, 0), (0, K_pad - K)))
        W_g = jnp.pad(W_g, ((0, 0), (0, K_pad - K)))
    num_k = K_pad // tk

    grid_spec = pltpu.PrefetchScalarGridSpec(
        num_scalar_prefetch=0,
        grid=(n_splits, num_k),
        in_specs=[
            # TODO(synk): when n_splits==2 a grid-resident y block would remove the
            # duplicated (tiny, B-row) y stream; it is noise next to W_g's N rows.
            pl.BlockSpec((B, tk), lambda n, k: (0, k)),          # y tile
            _wg_block_spec(tn, tk, wg_bufs),                     # W_g tile (streamed)
        ],
        out_specs=pl.BlockSpec((1, B, 1), lambda n, k: (n, 0, 0)),
        scratch_shapes=[pltpu.VMEM((B, tn), jnp.float32)],       # per-split g accumulator
    )

    partial_sumsq = pl.pallas_call(
        _plp_sumsq_kernel,
        out_shape=jax.ShapeDtypeStruct((n_splits, B, 1), jnp.float32),
        grid_spec=grid_spec,
        compiler_params=pltpu.CompilerParams(
            dimension_semantics=("parallel", "arbitrary"),
            vmem_limit_bytes=vmem_limit),
        cost_estimate=pl.CostEstimate(
            flops=2 * B * K_pad * N,
            transcendentals=0,
            bytes_accessed=(N * K_pad + n_splits * B * K_pad) * itemsize
                           + n_splits * B * 4),
    )(y_flat, W_g)

    # ---- tiny O(B) scalar epilogue: norm, EMA, loss, buffer updates ----
    sumsq = jnp.sum(partial_sumsq[:, :, 0], axis=0)                       # [B]
    # Fold the 1/sqrt(H*W) gradient scale and the 1/sqrt(L) layer-mean here.
    norm = jnp.sqrt(sumsq) * jnp.float32(inv_sqrt_hw / math.sqrt(L))      # [B]

    steps_f = jnp.asarray(steps, jnp.float32)
    exp_f = jnp.asarray(exp_sum_a, jnp.float32)
    denom = 1.0 - jnp.power(jnp.float32(beta), steps_f)
    a = exp_f / jnp.maximum(denom, jnp.float32(1e-8))   # guarded: no 0/0 at steps == 0
    loss = jnp.where(steps_f > 0, jnp.mean((norm - a) ** 2), jnp.float32(0.0))
    mean_norm = jnp.mean(norm)
    new_exp = jnp.float32(beta) * exp_f + jnp.float32(1.0 - beta) * mean_norm
    new_steps = steps_f + 1.0
    return loss, new_steps, new_exp


# --------------------------------------------------------------------------- #
# Pure-JAX reference replicating the PyTorch forward (uses autograd).
# --------------------------------------------------------------------------- #
def _reference(w, x, y, W_g, steps, exp_sum_a, beta):
    B, C, H, Wd = x.shape

    def output_fn(w_):
        x_ = jnp.dot(w_.reshape(B, -1), W_g,
                     precision=jax.lax.Precision.HIGHEST).reshape(B, C, H, Wd)
        return jnp.sum(x_ * y) / math.sqrt(H * Wd)

    grads = jax.grad(output_fn)(w)                                        # [B, L, D]
    norm = jnp.sqrt(jnp.mean(jnp.sum(grads ** 2, axis=2), axis=1))        # [B]
    if steps > 0:
        a = exp_sum_a / (1.0 - beta ** steps)
        loss = float(jnp.mean((norm - a) ** 2))
    else:
        loss = 0.0
    mean = float(jnp.mean(norm))
    new_exp = beta * exp_sum_a + (1.0 - beta) * mean
    new_steps = steps + 1.0
    return loss, new_steps, new_exp


if __name__ == "__main__":
    beta = 0.99
    B, C, H, W = 2, 4, 16, 16        # x: NCHW
    L, D = 8, 32                     # w: [B, n_layers, d_latent]

    key = jax.random.PRNGKey(0)
    k_w, k_g, k_y1, k_y2, k_g2, k_y3 = jax.random.split(key, 6)
    w = jax.random.normal(k_w, (B, L, D), jnp.float32)
    W_g = jax.random.normal(k_g, (L * D, C * H * W), jnp.float32) * 0.05  # synthetic generator weight
    x = jnp.dot(w.reshape(B, -1), W_g).reshape(B, C, H, W)                # generator output
    y1 = jax.random.normal(k_y1, x.shape, jnp.float32)                    # torch.randn(x.shape)
    y2 = jax.random.normal(k_y2, x.shape, jnp.float32)

    # Buffers (nn.Parameter(..., requires_grad=False) equivalents).
    steps = jnp.float32(0.0)
    exp_sum_a = jnp.float32(0.0)

    # max_tk=256 -> K streamed as 4 accumulated tiles even at toy shapes.
    loss1, steps1, exp1 = path_length_penalty(w, x, y1, W_g, steps, exp_sum_a,
                                              beta=beta, max_tk=256)
    jax.block_until_ready(loss1)
    rl1, rs1, re1 = _reference(w, x, y1, W_g, float(steps), float(exp_sum_a), beta)

    loss2, steps2, exp2 = path_length_penalty(w, x, y2, W_g, steps1, exp1,
                                              beta=beta, max_tk=256)
    jax.block_until_ready(loss2)
    rl2, rs2, re2 = _reference(w, x, y2, W_g, rs1, re1, beta)

    # Tolerances accommodate the MXU's f32 precision regime (regularizer-level accuracy).
    np.testing.assert_allclose(float(loss1), rl1, rtol=0, atol=1e-6)      # steps==0 -> 0
    np.testing.assert_allclose(float(exp1), re1, rtol=1e-2, atol=1e-6)
    np.testing.assert_allclose(float(steps1), rs1, rtol=0, atol=0)
    np.testing.assert_allclose(float(loss2), rl2, rtol=0.15, atol=1e-4)
    np.testing.assert_allclose(float(exp2), re2, rtol=1e-2, atol=1e-6)
    np.testing.assert_allclose(float(steps2), rs2, rtol=0, atol=0)

    # Ragged K (C*H*W not a multiple of the K tile): exercises host-side zero padding.
    Cr, Hr, Wr = 3, 10, 10                                   # K = 300 -> padded
    W_g2 = jax.random.normal(k_g2, (L * D, Cr * Hr * Wr), jnp.float32) * 0.05
    xr = jnp.dot(w.reshape(B, -1), W_g2).reshape(B, Cr, Hr, Wr)
    y3 = jax.random.normal(k_y3, xr.shape, jnp.float32)
    loss_r, steps_r, exp_r = path_length_penalty(w, xr, y3, W_g2, steps1, exp1,
                                                 beta=beta, max_tk=256)
    jax.block_until_ready(loss_r)
    rlr, rsr, rer = _reference(w, xr, y3, W_g2, rs1, re1, beta)
    np.testing.assert_allclose(float(loss_r), rlr, rtol=0.15, atol=1e-4)
    np.testing.assert_allclose(float(exp_r), rer, rtol=1e-2, atol=1e-6)

    # bf16 weight streaming (halves HBM bytes on the dominant operand; looser numerics).
    loss_bf, steps_bf, exp_bf = path_length_penalty(
        w, x, y2, W_g, steps1, exp1, beta=beta,
        stream_dtype=jnp.bfloat16, max_tk=256)
    jax.block_until_ready(loss_bf)
    assert np.isfinite(float(loss_bf)) and np.isfinite(float(exp_bf))
    np.testing.assert_allclose(float(exp_bf), re2, rtol=1e-1)

    print("KERNEL_OK")
</pallas_src>

<mosaic_0001>
module attributes {stable_mosaic.version = 11 : i64} {
  func.func @_plp_sumsq_kernel(%arg0: i32, %arg1: i32, %arg2: memref<2x256xf32, #tpu.memory_space<vmem>>, %arg3: memref<256x256xf32, #tpu.memory_space<vmem>>, %arg4: memref<1x2x1xf32, #tpu.memory_space<vmem>>, %arg5: memref<2x256xf32, #tpu.memory_space<vmem>>) attributes {dimension_semantics = [#tpu.dimension_semantics<parallel>, #tpu.dimension_semantics<arbitrary>], iteration_bounds = array<i64: 1, 4>, scalar_prefetch = 0 : i64, scratch_operands = 1 : i64, tpu.core_type = #tpu.core_type<tc>, window_params = [{transform_indices = @transform_0, window_bounds = array<i64: 2, 256>}, {transform_indices = @transform_1, window_bounds = array<i64: 256, 256>}, {transform_indices = @transform_2, window_bounds = array<i64: 1, 2, 1>}]} {
    %c0_i32 = arith.constant 0 : i32
    %0 = arith.cmpi eq, %arg1, %c0_i32 : i32
    %1 = arith.extui %0 : i1 to i32
    %c0_i32_0 = arith.constant 0 : i32
    %2 = arith.cmpi ne, %1, %c0_i32_0 : i32
    scf.if %2 {
      %cst_9 = arith.constant 0.000000e+00 : f32
      %12 = vector.broadcast %cst_9 : f32 to vector<2x256xf32>
      %c0_10 = arith.constant 0 : index
      %c0_11 = arith.constant 0 : index
      %13 = vector.load %arg5[%c0_10, %c0_11] : memref<2x256xf32, #tpu.memory_space<vmem>>, vector<2x256xf32>
      tpu.vector_store %arg5[%c0_10, %c0_11], %12 {strides = array<i32>} : memref<2x256xf32, #tpu.memory_space<vmem>>, vector<2x256xf32>,
    } else {
    }
    %c0 = arith.constant 0 : index
    %c0_1 = arith.constant 0 : index
    %3 = vector.load %arg5[%c0, %c0_1] : memref<2x256xf32, #tpu.memory_space<vmem>>, vector<2x256xf32>
    %c0_2 = arith.constant 0 : index
    %c0_3 = arith.constant 0 : index
    %4 = vector.load %arg2[%c0_2, %c0_3] : memref<2x256xf32, #tpu.memory_space<vmem>>, vector<2x256xf32>
    %c0_4 = arith.constant 0 : index
    %c0_5 = arith.constant 0 : index
    %5 = vector.load %arg3[%c0_4, %c0_5] : memref<256x256xf32, #tpu.memory_space<vmem>>, vector<256x256xf32>
    %cst = arith.constant dense<0.000000e+00> : vector<2x256xf32>
    %6 = tpu.matmul %4, %5, %cst {dimension_numbers = #tpu.dot_dimension_numbers<[1], [1], [0], [0], [0, 0, 1, 0], [], []>} : vector<2x256xf32>, vector<256x256xf32>, vector<2x256xf32> -> vector<2x256xf32>
    %7 = arith.addf %3, %6 : vector<2x256xf32>
    %c0_6 = arith.constant 0 : index
    %c0_7 = arith.constant 0 : index
    %8 = vector.load %arg5[%c0_6, %c0_7] : memref<2x256xf32, #tpu.memory_space<vmem>>, vector<2x256xf32>
    tpu.vector_store %arg5[%c0_6, %c0_7], %7 {strides = array<i32>} : memref<2x256xf32, #tpu.memory_space<vmem>>, vector<2x256xf32>,
    %c3_i32 = arith.constant 3 : i32
    %9 = arith.cmpi eq, %arg1, %c3_i32 : i32
    %10 = arith.extui %9 : i1 to i32
    %c0_i32_8 = arith.constant 0 : i32
    %11 = arith.cmpi ne, %10, %c0_i32_8 : i32
    scf.if %11 {
      %c0_9 = arith.constant 0 : index
      %c0_10 = arith.constant 0 : index
      %12 = vector.load %arg5[%c0_9, %c0_10] : memref<2x256xf32, #tpu.memory_space<vmem>>, vector<2x256xf32>
      %13 = arith.mulf %12, %12 : vector<2x256xf32>
      %cst_11 = arith.constant dense<0.000000e+00> : vector<2xf32>
      %14 = vector.multi_reduction <add>, %13, %cst_11 [1] : vector<2x256xf32> to vector<2xf32>
      %15 = vector.shape_cast %14 : vector<2xf32> to vector<2x1xf32>
      %c0_12 = arith.constant 0 : index
      %c0_13 = arith.constant 0 : index
      %c0_14 = arith.constant 0 : index
      %16 = vector.load %arg4[%c0_12, %c0_13, %c0_14] : memref<1x2x1xf32, #tpu.memory_space<vmem>>, vector<1x2x1xf32>
      %17 = vector.shape_cast %16 : vector<1x2x1xf32> to vector<2x1xf32>
      %18 = vector.shape_cast %15 : vector<2x1xf32> to vector<1x2x1xf32>
      tpu.vector_store %arg4[%c0_12, %c0_13, %c0_14], %18 {strides = array<i32>} : memref<1x2x1xf32, #tpu.memory_space<vmem>>, vector<1x2x1xf32>,
    } else {
    }
    return
  }
  func.func @transform_0(%arg0: i32, %arg1: i32) -> (i32, i32) {
    %c0_i32 = arith.constant 0 : i32
    %c0_i32_0 = arith.constant 0 : i32
    return %c0_i32, %arg1 : i32, i32
  }
  func.func @transform_1(%arg0: i32, %arg1: i32) -> (i32, i32) {
    %c0_i32 = arith.constant 0 : i32
    return %arg0, %arg1 : i32, i32
  }
  func.func @transform_2(%arg0: i32, %arg1: i32) -> (i32, i32, i32) {
    %c0_i32 = arith.constant 0 : i32
    %c0_i32_0 = arith.constant 0 : i32
    %c0_i32_1 = arith.constant 0 : i32
    return %arg0, %c0_i32, %c0_i32_0 : i32, i32, i32
  }
}

</mosaic_0001>

<bundles_post_ra>
// kernel: tpu_custom_call.1
= control target key start
LH: loop header
LB: loop body
LE: loop exit
PB: predicated region body
PF: predicated region fallthrough
CT: control target
= control target key end

     0   :  { %7 = vsyncpa [#allocation4], 0  ;;  %s901_s0 = inlined_call_operand.hbm [shape: f32[2,1024], index: 0, kind: input, shape index: {}]   ;;  %s902_s1 = inlined_call_operand.hbm [shape: f32[256,1024], index: 1, kind: input, shape index: {}]   ;;  %s903_s2 = inlined_call_operand.vmem [shape: f32[1,2,1], index: 2, kind: output, shape index: {}]  }
   0x1   :  { %9 = vsyncpa [#allocation4 + $0x1], 0 }
   0x2   :  { %10 = vsyncpa [#allocation6], 0 }
   0x3   :  { %12 = vsyncpa [#allocation6 + $0x1], 0  ;;  %s722_s9 = smov 0   ;;  %s724_s10 = smov 0  }
   0x4   :  { %s726_s11 = smov 0   ;;  %s728_s12 = smov 0  }
   0x5   :  { %s730_s13 = smov 0   ;;  %s732_s14 = smov 0  }
   0x6 LB: > { %s504_s15 = sadd.s32 4294967295, %s701_s14   ;;  %s27_s16 = sadd.s32 1, %s697_s13  ;;  %s701_s14 = sphi %s732_s14, %s18_s14   ;;  %s697_s13 = sphi %s730_s13, %s911_s13   ;;  %s693_s12 = sphi %s728_s12, %s910_s12   ;;  %s689_s11 = sphi %s726_s11, %s909_s11   ;;  %s685_s10 = sphi %s724_s10, %s908_s10   ;;  %s681_s9 = sphi %s722_s9, %s907_s9  }
   0x7   : > { %p28_p0 = scmp.ge.s32.totalorder %s27_s16, 4  ;;  %s37_s17 = sadd.s32 1, %s689_s11 }
   0x8   : > { %p44_p1 = scmp.ne.s32.totalorder %s689_s11, %s685_s10  ;;  %p45_p2 = scmp.eq.s32.totalorder %s701_s14, 0 }
   0x9   : > { %s913_s16 = smov (%p28_p0, %s27_s16), 0  ;;  %p50_p4 = scmp.ne.s32.totalorder %s685_s10, %s681_s9 }
   0xa   : > { %p758_p3 = por %p45_p2, %p44_p1  ;;  %s34_s19 = ssub.s32 %s697_s13, %s913_s16 }
   0xb   : > { %p51_p5 = scmp.eq.s32.totalorder %s504_s15, 0  ;;  %p35_p6 = scmp.eq.s32.totalorder %s34_s19, 0 }
   0xc   : > { %p534_p8 = scmp.lt.s32.totalorder %s701_s14, 4  ;;  %s774_s22 = sand.u32 1, %s689_s11  }
   0xd   : > { %p765_p7 = por %p51_p5, %p50_p4  ;;  %s521_s23 = sshll.u32 %s697_s13, 2 }
   0xe   : > { %s771_s21 = scalar_select %p35_p6, %s689_s11, %s37_s17  }
   0xf   : > { %s507_s24 = sshll.u32 %s774_s22, 2  ;;  %s137_s27 = scalar_lea.hbm %s901_s0, %s521_s23 }
  0x10   : > { %s139_s28 = sshll.u32 %s137_s27, 4  ;;  %s132_s29 = scalar_lea.vmem [#allocation3], %s507_s24  ;;  %s140_s28 = int_to_ptr.hbm [resolvable:$true] %s139_s28 }
  0x11   : > { %s141_s30 = sshll.u32 %s132_s29, 4  ;;  %p783_p9 = pnand %p534_p8, %p758_p3  ;;  %s142_s30 = int_to_ptr.vmem [resolvable:$true] %s141_s30 }
  0x12   : > { %s510_s4 = sshll.u32 %s774_s22, 9  ;;  %s522_s5 = sshll.u32 %s697_s13, 4 }
  0x13   : > { %s129_s6 = scalar_lea.sflag [#allocation4], %s774_s22  ;;  %p513_p10 = scmp.ge.s32.totalorder %s701_s14, 1 }
  0x14   : > { %530 = dma.hbm_to_vmem [thread:$0]  (!%p783_p9), %s140_s28, 64, %s142_s30, %s129_s6  }
  0x15   : > { %p171_p11 = scmp.lt.s32.totalorder %s701_s14, 5  ;;  %s160_s9 = scalar_lea.hbm %s902_s1, %s522_s5 }
  0x16   : > { %s152_s15 = scalar_lea.vmem [#allocation5], %s510_s4  ;;  %s161_s18 = sshll.u32 %s160_s9, 4  ;;  %s162_s18 = int_to_ptr.hbm [resolvable:$true] %s161_s18 }
  0x17   : > { %s163_s17 = sshll.u32 %s152_s15, 4  ;;  %p172_p12 = pnand %p513_p10, %p171_p11  ;;  %s164_s17 = int_to_ptr.vmem [resolvable:$true] %s163_s17 }
  0x18   : > { %s149_s19 = scalar_lea.sflag [#allocation6], %s774_s22  ;;  %s703_s23 = smov 1024  }
  0x19   : > { %s704_s24 = smov 256   ;;  %s705_s25 = smov 16  }
  0x1a   : > { %533 = dma.hbm_to_vmem [thread:$0]  (!%p783_p9), %s162_s18, 8192, %s164_s17, %s149_s19, %s703_s23, %s704_s24, %s705_s25  }
  0x1b   : > { %175 = sbr.rel (%p172_p12) target bundleno = 386 (0x182), region = 28  ;;  %s177_s26 = sand.u32 (!%p172_p12), 1, %s685_s10  }
  0x1c   : > { %s514_s27 = sshll.u32 (!%p172_p12), %s177_s26, 2  ;;  %s178_s28 = scalar_lea.sflag (!%p172_p12), [#allocation4], %s177_s26 }
  0x1d   : > { %s801_s29 = scalar_lea.vmem (!%p172_p12), [#allocation3], %s514_s27 }
  0x20   : > { %672 = dma.done.wait (%p765_p7), %s178_s28, 64  }
  0x21   : > { %674 = vsyncadd (%p765_p7), %s178_s28, 4294967232  ;;  %s515_s22 = sshll.u32 %s177_s26, 9  ;;  %s188_s30 = scalar_lea.sflag [#allocation6], %s177_s26 }
  0x22   : > { %s807_s4 = scalar_lea.vmem [#allocation5], %s515_s22 }
  0x23   : > { %676 = dma.done.wait (%p765_p7), %s188_s30, 8192  }
  0x24   : > { %678 = vsyncadd (%p765_p7), %s188_s30, 4294959104  ;;  %p516_p13 = scmp.ne.s32.totalorder %s693_s12, 0 }
  0x26   : > { %227 = sbr.rel (%p516_p13) target bundleno = 45 (0x2d), region = 40 }
  0x2b   : > { %v706_v0 = vmov 0.0  }
  0x2c   : > { %228 = vst [vmem:[#allocation2] sm:$0xf] %v706_v0 }
  0x2d PF: > { %v293_v1 = vld [vmem:[%s807_s4 + $0x1f0] sm:$0xff]  ;;  %v294_v2 = vld [vmem:[%s807_s4 + $0x1f8] sm:$0xff]  ;;  %v291_v5 = vld [vmem:[%s807_s4 + $0x1e0] sm:$0xff]  ;;  %vm384_vm0 = vcmask 1041408   ;;  %p517_p0 = scmp.ne.s32.totalorder %s693_s12, 3 }
  0x2e   : > { %341 = vmatpush.xpose.msra.mxu2 %v293_v1  ;;  %361 = vmatpush.xpose.msra.mxu3 %v294_v2  ;;  %v261_v3 = vld [vmem:[%s807_s4 + $0xf0] sm:$0xff]  ;;  %v262_v4 = vld [vmem:[%s807_s4 + $0xf8] sm:$0xff]  ;;  %v292_v6 = vld [vmem:[%s807_s4 + $0x1e8] sm:$0xff] }
  0x2f   : > { %301 = vmatpush.xpose.msra.mxu0 %v261_v3  ;;  %321 = vmatpush.xpose.msra.mxu1 %v262_v4  ;;  %v259_v7 = vld [vmem:[%s807_s4 + $0xe0] sm:$0xff]  ;;  %v260_v8 = vld [vmem:[%s807_s4 + $0xe8] sm:$0xff]  ;;  %v289_v9 = vld [vmem:[%s807_s4 + $0x1d0] sm:$0xff] }
  0x30   : > { %v290_v10 = vld [vmem:[%s807_s4 + $0x1d8] sm:$0xff]  ;;  %v257_v11 = vld [vmem:[%s807_s4 + $0xd0] sm:$0xff]  ;;  %v287_v13 = vld [vmem:[%s807_s4 + $0x1c0] sm:$0xff] }
  0x31   : > { %v258_v12 = vld [vmem:[%s807_s4 + $0xd8] sm:$0xff]  ;;  %v288_v14 = vld [vmem:[%s807_s4 + $0x1c8] sm:$0xff]  ;;  %v255_v15 = vld [vmem:[%s807_s4 + $0xc0] sm:$0xff] }
  0x32   : > { %342 = vmatpush.xpose.msra.mxu2 %v291_v5  ;;  %362 = vmatpush.xpose.msra.mxu3 %v292_v6  ;;  %v256_v16 = vld [vmem:[%s807_s4 + $0xc8] sm:$0xff]  ;;  %v285_v17 = vld [vmem:[%s807_s4 + $0x1b0] sm:$0xff]  ;;  %v286_v18 = vld [vmem:[%s807_s4 + $0x1b8] sm:$0xff] }
  0x33   : > { %302 = vmatpush.xpose.msra.mxu0 %v259_v7  ;;  %322 = vmatpush.xpose.msra.mxu1 %v260_v8  ;;  %v253_v19 = vld [vmem:[%s807_s4 + $0xb0] sm:$0xff]  ;;  %v254_v20 = vld [vmem:[%s807_s4 + $0xb8] sm:$0xff]  ;;  %v283_v21 = vld [vmem:[%s807_s4 + $0x1a0] sm:$0xff] }
  0x34   : > { %v284_v22 = vld [vmem:[%s807_s4 + $0x1a8] sm:$0xff]  ;;  %v251_v23 = vld [vmem:[%s807_s4 + $0xa0] sm:$0xff]  ;;  %v281_v25 = vld [vmem:[%s807_s4 + $0x190] sm:$0xff] }
  0x35   : > { %v252_v24 = vld [vmem:[%s807_s4 + $0xa8] sm:$0xff]  ;;  %v282_v26 = vld [vmem:[%s807_s4 + $0x198] sm:$0xff]  ;;  %v249_v27 = vld [vmem:[%s807_s4 + $0x90] sm:$0xff] }
  0x36   : > { %343 = vmatpush.xpose.msra.mxu2 %v289_v9  ;;  %363 = vmatpush.xpose.msra.mxu3 %v290_v10  ;;  %v250_v28 = vld [vmem:[%s807_s4 + $0x98] sm:$0xff]  ;;  %v279_v30 = vld [vmem:[%s807_s4 + $0x180] sm:$0xff]  ;;  %v280_v31 = vld [vmem:[%s807_s4 + $0x188] sm:$0xff] }
  0x37   : > { %303 = vmatpush.xpose.msra.mxu0 %v257_v11  ;;  %323 = vmatpush.xpose.msra.mxu1 %v258_v12  ;;  %v230_v29 = vld [vmem:[%s801_s29] sm:$0xf]  ;;  %v247_v32 = vld [vmem:[%s807_s4 + $0x80] sm:$0xff]  ;;  %v248_v33 = vld [vmem:[%s807_s4 + $0x88] sm:$0xff] }
  0x38   : > { %296 = vst [vmem:[#allocation1] ss:$4 sm:$0xff] %v230_v29  ;;  %v277_v34 = vld [vmem:[%s807_s4 + $0x170] sm:$0xff]  ;;  %v278_v35 = vld [vmem:[%s807_s4 + $0x178] sm:$0xff]  ;;  %v275_v38 = vld [vmem:[%s807_s4 + $0x160] sm:$0xff] }
  0x39   : > { %v245_v36 = vld [vmem:[%s807_s4 + $0x70] sm:$0xff]  ;;  %v246_v37 = vld [vmem:[%s807_s4 + $0x78] sm:$0xff]  ;;  %v276_v39 = vld [vmem:[%s807_s4 + $0x168] sm:$0xff] }
  0x3a   : > { %344 = vmatpush.xpose.msra.mxu2 %v287_v13  ;;  %364 = vmatpush.xpose.msra.mxu3 %v288_v14  ;;  %v243_v40 = vld [vmem:[%s807_s4 + $0x60] sm:$0xff]  ;;  %v244_v41 = vld [vmem:[%s807_s4 + $0x68] sm:$0xff]  ;;  %v273_v42 = vld [vmem:[%s807_s4 + $0x150] sm:$0xff] }
  0x3b   : > { %304 = vmatpush.xpose.msra.mxu0 %v255_v15  ;;  %324 = vmatpush.xpose.msra.mxu1 %v256_v16  ;;  %v274_v43 = vld [vmem:[%s807_s4 + $0x158] sm:$0xff]  ;;  %v241_v44 = vld [vmem:[%s807_s4 + $0x50] sm:$0xff]  ;;  %v271_v46 = vld [vmem:[%s807_s4 + $0x140] sm:$0xff] }
  0x3c   : > { %v242_v45 = vld [vmem:[%s807_s4 + $0x58] sm:$0xff]  ;;  %v272_v47 = vld [vmem:[%s807_s4 + $0x148] sm:$0xff]  ;;  %v239_v48 = vld [vmem:[%s807_s4 + $0x40] sm:$0xff] }
  0x3d   : > { %v240_v49 = vld [vmem:[%s807_s4 + $0x48] sm:$0xff]  ;;  %v269_v50 = vld [vmem:[%s807_s4 + $0x130] sm:$0xff]  ;;  %v270_v51 = vld [vmem:[%s807_s4 + $0x138] sm:$0xff] }
  0x3e   : > { %345 = vmatpush.xpose.msra.mxu2 %v285_v17  ;;  %365 = vmatpush.xpose.msra.mxu3 %v286_v18  ;;  %v237_v52 = vld [vmem:[%s807_s4 + $0x30] sm:$0xff]  ;;  %v238_v53 = vld [vmem:[%s807_s4 + $0x38] sm:$0xff]  ;;  %v267_v54 = vld [vmem:[%s807_s4 + $0x120] sm:$0xff] }
  0x3f   : > { %305 = vmatpush.xpose.msra.mxu0 %v253_v19  ;;  %325 = vmatpush.xpose.msra.mxu1 %v254_v20  ;;  %v268_v55 = vld [vmem:[%s807_s4 + $0x128] sm:$0xff]  ;;  %v235_v56 = vld [vmem:[%s807_s4 + $0x20] sm:$0xff]  ;;  %v265_v58 = vld [vmem:[%s807_s4 + $0x110] sm:$0xff] }
  0x40   : > { %v236_v57 = vld [vmem:[%s807_s4 + $0x28] sm:$0xff]  ;;  %v266_v59 = vld [vmem:[%s807_s4 + $0x118] sm:$0xff]  ;;  %v233_v60 = vld [vmem:[%s807_s4 + $0x10] sm:$0xff] }
  0x41   : > { %v234_v61 = vld [vmem:[%s807_s4 + $0x18] sm:$0xff]  ;;  %v263_v62 = vld [vmem:[%s807_s4 + $0x100] sm:$0xff]  ;;  %v264_v63 = vld [vmem:[%s807_s4 + $0x108] sm:$0xff] }
  0x42   : > { %346 = vmatpush.xpose.msra.mxu2 %v283_v21  ;;  %366 = vmatpush.xpose.msra.mxu3 %v284_v22  ;;  %v231_v0 = vld [vmem:[%s807_s4] sm:$0xff]  ;;  %v232_v1 = vld [vmem:[%s807_s4 + $0x8] sm:$0xff]  ;;  %v298_v3 = vld.sshfl [vmem:[#allocation1 + $0x8] sm:$0xff pattern:$0x73625140] }
  0x43   : > { %306 = vmatpush.xpose.msra.mxu0 %v251_v23  ;;  %326 = vmatpush.xpose.msra.mxu1 %v252_v24  ;;  %v297_v2 = vld.sshfl [vmem:[#allocation1] sm:$0xff pattern:$0x73625140]  ;;  %v229_v11 = vld [vmem:[#allocation2] sm:$0xf] }
  0x46   : > { %347 = vmatpush.xpose.msra.mxu2 %v281_v25  ;;  %367 = vmatpush.xpose.msra.mxu3 %v282_v26 }
  0x47   : > { %307 = vmatpush.xpose.msra.mxu0 %v249_v27  ;;  %327 = vmatpush.xpose.msra.mxu1 %v250_v28 }
  0x4a   : > { %348 = vmatpush.xpose.msra.mxu2 %v279_v30  ;;  %368 = vmatpush.xpose.msra.mxu3 %v280_v31 }
  0x4b   : > { %308 = vmatpush.xpose.msra.mxu0 %v247_v32  ;;  %328 = vmatpush.xpose.msra.mxu1 %v248_v33 }
  0x4e   : > { %349 = vmatpush.xpose.msra.mxu2 %v277_v34  ;;  %369 = vmatpush.xpose.msra.mxu3 %v278_v35 }
  0x4f   : > { %309 = vmatpush.xpose.msra.mxu0 %v245_v36  ;;  %329 = vmatpush.xpose.msra.mxu1 %v246_v37 }
  0x52   : > { %350 = vmatpush.xpose.msra.mxu2 %v275_v38  ;;  %370 = vmatpush.xpose.msra.mxu3 %v276_v39 }
  0x53   : > { %310 = vmatpush.xpose.msra.mxu0 %v243_v40  ;;  %330 = vmatpush.xpose.msra.mxu1 %v244_v41 }
  0x56   : > { %351 = vmatpush.xpose.msra.mxu2 %v273_v42  ;;  %371 = vmatpush.xpose.msra.mxu3 %v274_v43 }
  0x57   : > { %311 = vmatpush.xpose.msra.mxu0 %v241_v44  ;;  %331 = vmatpush.xpose.msra.mxu1 %v242_v45 }
  0x5a   : > { %352 = vmatpush.xpose.msra.mxu2 %v271_v46  ;;  %372 = vmatpush.xpose.msra.mxu3 %v272_v47 }
  0x5b   : > { %312 = vmatpush.xpose.msra.mxu0 %v239_v48  ;;  %332 = vmatpush.xpose.msra.mxu1 %v240_v49 }
  0x5e   : > { %353 = vmatpush.xpose.msra.mxu2 %v269_v50  ;;  %373 = vmatpush.xpose.msra.mxu3 %v270_v51 }
  0x5f   : > { %313 = vmatpush.xpose.msra.mxu0 %v237_v52  ;;  %333 = vmatpush.xpose.msra.mxu1 %v238_v53 }
  0x62   : > { %354 = vmatpush.xpose.msra.mxu2 %v267_v54  ;;  %374 = vmatpush.xpose.msra.mxu3 %v268_v55 }
  0x63   : > { %314 = vmatpush.xpose.msra.mxu0 %v235_v56  ;;  %334 = vmatpush.xpose.msra.mxu1 %v236_v57 }
  0x66   : > { %355 = vmatpush.xpose.msra.mxu2 %v265_v58  ;;  %375 = vmatpush.xpose.msra.mxu3 %v266_v59 }
  0x67   : > { %315 = vmatpush.xpose.msra.mxu0 %v233_v60  ;;  %335 = vmatpush.xpose.msra.mxu1 %v234_v61 }
  0x6a   : > { %356 = vmatpush.xpose.msra.mxu2 %v263_v62  ;;  %376 = vmatpush.xpose.msra.mxu3 %v264_v63 }
  0x6b   : > { %316 = vmatpush.xpose.msra.mxu0 %v231_v0  ;;  %336 = vmatpush.xpose.msra.mxu1 %v232_v1 }
  0x6d   : > { %357 = vmatmul.f32.vlgmr.msra.gmra.mxu2 %v297_v2  ;;  %377 = vmatmul.f32.vlgmr.msra.gmra.mxu3 %v298_v3 }
  0x6e   : > { %317 = vmatmul.f32.vlgmr.msra.gmra.mxu0 %v297_v2  ;;  %337 = vmatmul.f32.vlgmr.msra.gmra.mxu1 %v298_v3 }
  0xeb   : > { %v318_v4 = vpop.f32.mrf.mxu0  ;;  %v338_v5 = vpop.f32.mrf.mxu1 }
  0xec   : > { %v339_v9 = vadd.f32 %v338_v5, %v318_v4 }
  0xf0   : > { %v358_v6 = vpop.f32.mrf.mxu2  ;;  %v378_v7 = vpop.f32.mrf.mxu3 }
  0xf1   : > { %v379_v8 = vadd.f32 %v378_v7, %v358_v6 }
  0xf3   : > { %v383_v10 = vrot.slane %v379_v8, 6 }
  0xf4   : > { %392 = sbr.rel (%p517_p0) target bundleno = 386 (0x182), region = 44 }
  0xf5   : > { %v385_v12 = vsel %vm384_vm0, %v339_v9, %v383_v10 }
  0xf6   : > { %v387_v13 = vadd.f32 %v385_v12, %v229_v11 }
  0xf8   : > { %388 = vst [vmem:[#allocation2] sm:$0xf] %v387_v13 }
  0xf9   : > { %vm406_vm1 = vcmask 1024  }
  0xff   : > { %v393_v14 = vld [vmem:[#allocation2] sm:$0xf] }
 0x100   : > { %v394_v15 = vmul.f32 %v393_v14, %v393_v14 }
 0x102   : > { %396 = vst [vmem:[#allocation1] ss:$4 sm:$0xff] %v394_v15 }
 0x109   : > { %v397_v16 = vld.sshfl [vmem:[#allocation1] sm:$0xff pattern:$0x73625140]  ;;  %v398_v17 = vld.sshfl [vmem:[#allocation1 + $0x8] sm:$0xff pattern:$0x73625140] }
 0x10a   : > { %v401_v18 = vsel %vm384_vm0, %v397_v16, 0.0  ;;  %v402_v19 = vsel %vm384_vm0, %v398_v17, 0.0 }
 0x10b   : > { %v403_v20 = vadd.f32 %v402_v19, %v401_v18 }
 0x10d   : > { %404 = vadd.xlane.f32.xlu0 %v403_v20 }
 0x180   : > { %v405_v21 = vpop.xlane.xlu0 %404 }
 0x181   : > { %407 = vst.msk [vmem:[%s903_s2] sm:$0x3] %vm406_vm1, %v405_v21 }
 0x182 PF: > { %s18_s14 = sadd.s32 1, %s701_s14   ;;  %s907_s9 = smov %s685_s10 }
 0x183   : > { %p15_p1 = scmp.ge.s32.totalorder %s18_s14, 6   ;;  %s908_s10 = smov %s689_s11 }
 0x184   : > { %s909_s11 = smov %s771_s21  ;;  %s910_s12 = smov %s697_s13 }
 0x185   : > { %s911_s13 = smov %s913_s16  ;;  %17 = sbr.rel (!%p15_p1) target bundleno = 6 (0x6), region = 89 }
 0x18a   :  { %427 = vsyncpa [#allocation4], 1 }
 0x18b   :  { %429 = vsyncpa [#allocation4 + $0x1], 1 }
 0x18c   :  { %430 = vsyncpa [#allocation6], 1 }
 0x18d   :  { %432 = vsyncpa [#allocation6 + $0x1], 1 }

</bundles_post_ra>
